<compile_context>
chip_gen: v7x
topology: tpu7x:2x2x1
jax: 0.10.0
libtpu: 0.0.40
codegen_flags: <defaults>
</compile_context>

<pallas_src>
import jax
import jax.numpy as jnp
from jax.experimental import pallas as pl
from jax.experimental.pallas import tpu as pltpu


def se_block(x_nchw, cfc_w, cfc_b, fc_w, fc_b, *, max_tile_bytes=4 * 1024 * 1024):
    """SEBlock forward.

    Args:
      x_nchw: (B, C, H, W) input.
      cfc_w:  (C, 1, 2) depthwise Conv1d weight (kernel_size=2, groups=C).
      cfc_b:  (C,)      depthwise Conv1d bias.
      fc_w:   (C, C)    Linear weight (out_features, in_features).
      fc_b:   (C,)      Linear bias.

    Returns:
      (B, C, 1) sigmoid channel weights (same semantics as the PyTorch module).
    """
    B, C, H, W = x_nchw.shape
    HW = H * W

    x_flat = x_nchw.reshape(B, C, HW)
    cfc_w2 = cfc_w.reshape(C, 2)
    cfc_b2 = cfc_b.reshape(C, 1)
    fc_b2 = fc_b.reshape(C, 1)

    out_dtype = jnp.promote_types(x_nchw.dtype, fc_w.dtype)

    # ---- Tile the spatial (lane) axis against a VMEM budget -------------------
    itemsize = jnp.dtype(x_flat.dtype).itemsize
    lane_cap = max(128, ((max_tile_bytes // (C * itemsize)) // 128) * 128)
    if HW <= lane_cap:
        t_hw = HW                 # single full-extent tile (no (8,128) constraint issue)
    else:
        t_hw = lane_cap           # lane-dense multiple of 128
    num_t = pl.cdiv(HW, t_hw)
    needs_mask = (HW % t_hw) != 0  # only possible when num_t > 1

    # ---- Explicit VMEM budget: double-buffered x tile + weights + slack -------
    tile_bytes = C * t_hw * itemsize
    weight_bytes = (cfc_w2.size + cfc_b2.size + fc_w.size + fc_b2.size) * 4
    out_bytes = C * jnp.dtype(out_dtype).itemsize
    vmem_limit = int(2 * tile_bytes + 4 * (weight_bytes + out_bytes) + (4 << 20))
    vmem_limit = max(vmem_limit, 8 << 20)

    def kernel(x_ref, cfc_w_ref, cfc_b_ref, fc_w_ref, fc_b_ref, o_ref,
               sum_ref, sumsq_ref):
        t = pl.program_id(1)

        @pl.when(t == 0)
        def _init():
            sum_ref[...] = jnp.zeros_like(sum_ref)
            sumsq_ref[...] = jnp.zeros_like(sumsq_ref)

        x = x_ref[0]                                         # (C, t_hw), input dtype
        if needs_mask:
            lane = jax.lax.broadcasted_iota(jnp.int32, (1, t_hw), 1)
            valid = (t * t_hw + lane) < HW
            x = jnp.where(valid, x, jnp.zeros((), x.dtype))

        # f32 accumulation straight from the input dtype (no live f32 tile copy).
        sum_ref[...] += jnp.sum(x, axis=-1, keepdims=True, dtype=jnp.float32)
        sumsq_ref[...] += jnp.sum(jnp.square(x), axis=-1, keepdims=True,
                                  dtype=jnp.float32)

        @pl.when(t == pl.num_programs(1) - 1)
        def _finalize():
            n = jnp.float32(HW)
            mean = sum_ref[...] / n                                   # (C, 1)
            # torch.std default: unbiased (divide by N-1).
            var = (sumsq_ref[...] - n * mean * mean) / jnp.float32(HW - 1)
            std = jnp.sqrt(jnp.maximum(var, 0.0))                     # (C, 1)

            # cfc: depthwise Conv1d(k=2, groups=C) over [mean, std] -> pure VPU.
            cw = cfc_w_ref[...].astype(jnp.float32)                   # (C, 2)
            z = (cw[:, 0:1] * mean + cw[:, 1:2] * std
                 + cfc_b_ref[...].astype(jnp.float32))                # (C, 1)

            # fc: Linear(C, C).  One tiny matvec per batch, only on the final
            # reduction step -> negligible, off the DMA critical path.
            logits = jnp.dot(fc_w_ref[...].astype(jnp.float32), z,
                             preferred_element_type=jnp.float32)
            logits = logits + fc_b_ref[...].astype(jnp.float32)       # (C, 1)
            o_ref[0] = jax.nn.sigmoid(logits).astype(o_ref.dtype)

    grid_spec = pltpu.PrefetchScalarGridSpec(
        num_scalar_prefetch=0,
        grid=(B, num_t),
        in_specs=[
            pl.BlockSpec((1, C, t_hw), lambda b, t: (b, 0, t)),   # x tile
            pl.BlockSpec((C, 2), lambda b, t: (0, 0)),            # cfc weight
            pl.BlockSpec((C, 1), lambda b, t: (0, 0)),            # cfc bias
            pl.BlockSpec((C, C), lambda b, t: (0, 0)),            # fc weight
            pl.BlockSpec((C, 1), lambda b, t: (0, 0)),            # fc bias
        ],
        out_specs=pl.BlockSpec((1, C, 1), lambda b, t: (b, 0, 0)),
        scratch_shapes=[
            pltpu.VMEM((C, 1), jnp.float32),   # running sum
            pltpu.VMEM((C, 1), jnp.float32),   # running sum of squares
        ],
    )

    return pl.pallas_call(
        kernel,
        out_shape=jax.ShapeDtypeStruct((B, C, 1), out_dtype),
        grid_spec=grid_spec,
        compiler_params=pltpu.CompilerParams(
            dimension_semantics=("parallel", "arbitrary"),
            vmem_limit_bytes=vmem_limit,
        ),
    )(x_flat, cfc_w2, cfc_b2, fc_w, fc_b2)


def _reference(x, cfc_w, cfc_b, fc_w, fc_b):
    """Plain-JAX mirror of the PyTorch forward."""
    b, c, h, w = x.shape
    flat = x.reshape(b, c, h * w).astype(jnp.float32)
    mean = flat.mean(axis=-1)                               # (b, c)
    std = jnp.std(flat, axis=-1, ddof=1)                    # unbiased, like torch.std
    cw = cfc_w.reshape(c, 2).astype(jnp.float32)
    z = (mean * cw[:, 0][None, :] + std * cw[:, 1][None, :]
         + cfc_b.astype(jnp.float32)[None, :])
    logits = z @ fc_w.astype(jnp.float32).T + fc_b.astype(jnp.float32)[None, :]
    return jax.nn.sigmoid(logits)[:, :, None]


if __name__ == "__main__":
    # planes=32, spatial 16x16, batch 2 -- small shapes consistent with the module.
    B, C, H, W = 2, 32, 16, 16

    key = jax.random.PRNGKey(0)
    kx, k1, k2, k3, k4 = jax.random.split(key, 5)

    x = jax.random.normal(kx, (B, C, H, W), dtype=jnp.float32)
    cfc_w = jax.random.normal(k1, (C, 1, 2), dtype=jnp.float32) * 0.1   # Conv1d(C,C,2,groups=C)
    cfc_b = jax.random.normal(k2, (C,), dtype=jnp.float32) * 0.1
    fc_w = jax.random.normal(k3, (C, C), dtype=jnp.float32) * 0.1       # Linear(C, C)
    fc_b = jax.random.normal(k4, (C,), dtype=jnp.float32) * 0.1

    y = se_block(x, cfc_w, cfc_b, fc_w, fc_b)
    y = jax.block_until_ready(y)

    y_ref = _reference(x, cfc_w, cfc_b, fc_w, fc_b)
    assert y.shape == (B, C, 1), f"bad output shape {y.shape}"
    assert jnp.allclose(y, y_ref, atol=1e-4, rtol=1e-4), "mismatch vs reference"

    print("KERNEL_OK")
</pallas_src>

<mosaic_0001>
module attributes {stable_mosaic.version = 11 : i64} {
  func.func @kernel(%arg0: i32, %arg1: i32, %arg2: memref<1x32x256xf32, #tpu.memory_space<vmem>>, %arg3: memref<32x2xf32, #tpu.memory_space<vmem>>, %arg4: memref<32x1xf32, #tpu.memory_space<vmem>>, %arg5: memref<32x32xf32, #tpu.memory_space<vmem>>, %arg6: memref<32x1xf32, #tpu.memory_space<vmem>>, %arg7: memref<1x32x1xf32, #tpu.memory_space<vmem>>, %arg8: memref<32x1xf32, #tpu.memory_space<vmem>>, %arg9: memref<32x1xf32, #tpu.memory_space<vmem>>) attributes {dimension_semantics = [#tpu.dimension_semantics<parallel>, #tpu.dimension_semantics<arbitrary>], iteration_bounds = array<i64: 2, 1>, scalar_prefetch = 0 : i64, scratch_operands = 2 : i64, tpu.core_type = #tpu.core_type<tc>, window_params = [{transform_indices = @transform_0, window_bounds = array<i64: 1, 32, 256>}, {pipeline_mode = #tpu.pipeline_mode<synchronous>, transform_indices = @transform_1, window_bounds = array<i64: 32, 2>}, {pipeline_mode = #tpu.pipeline_mode<synchronous>, transform_indices = @transform_2, window_bounds = array<i64: 32, 1>}, {pipeline_mode = #tpu.pipeline_mode<synchronous>, transform_indices = @transform_3, window_bounds = array<i64: 32, 32>}, {pipeline_mode = #tpu.pipeline_mode<synchronous>, transform_indices = @transform_4, window_bounds = array<i64: 32, 1>}, {transform_indices = @transform_5, window_bounds = array<i64: 1, 32, 1>}]} {
    %c0_i32 = arith.constant 0 : i32
    %0 = arith.cmpi eq, %arg1, %c0_i32 : i32
    %1 = arith.extui %0 : i1 to i32
    %c0_i32_0 = arith.constant 0 : i32
    %2 = arith.cmpi ne, %1, %c0_i32_0 : i32
    scf.if %2 {
      %cst_14 = arith.constant 0.000000e+00 : f32
      %19 = vector.broadcast %cst_14 : f32 to vector<32x1xf32>
      %c0_15 = arith.constant 0 : index
      %c0_16 = arith.constant 0 : index
      %20 = vector.load %arg8[%c0_15, %c0_16] : memref<32x1xf32, #tpu.memory_space<vmem>>, vector<32x1xf32>
      tpu.vector_store %arg8[%c0_15, %c0_16], %19 {strides = array<i32>} : memref<32x1xf32, #tpu.memory_space<vmem>>, vector<32x1xf32>,
      %cst_17 = arith.constant 0.000000e+00 : f32
      %21 = vector.broadcast %cst_17 : f32 to vector<32x1xf32>
      %c0_18 = arith.constant 0 : index
      %c0_19 = arith.constant 0 : index
      %22 = vector.load %arg9[%c0_18, %c0_19] : memref<32x1xf32, #tpu.memory_space<vmem>>, vector<32x1xf32>
      tpu.vector_store %arg9[%c0_18, %c0_19], %21 {strides = array<i32>} : memref<32x1xf32, #tpu.memory_space<vmem>>, vector<32x1xf32>,
    } else {
    }
    %c0 = arith.constant 0 : index
    %c0_1 = arith.constant 0 : index
    %c0_2 = arith.constant 0 : index
    %3 = vector.load %arg2[%c0, %c0_1, %c0_2] : memref<1x32x256xf32, #tpu.memory_space<vmem>>, vector<1x32x256xf32>
    %4 = vector.shape_cast %3 : vector<1x32x256xf32> to vector<32x256xf32>
    %c0_3 = arith.constant 0 : index
    %c0_4 = arith.constant 0 : index
    %5 = vector.load %arg8[%c0_3, %c0_4] : memref<32x1xf32, #tpu.memory_space<vmem>>, vector<32x1xf32>
    %cst = arith.constant dense<0.000000e+00> : vector<32xf32>
    %6 = vector.multi_reduction <add>, %4, %cst [1] : vector<32x256xf32> to vector<32xf32>
    %7 = vector.shape_cast %6 : vector<32xf32> to vector<32x1xf32>
    %8 = arith.addf %5, %7 : vector<32x1xf32>
    %c0_5 = arith.constant 0 : index
    %c0_6 = arith.constant 0 : index
    %9 = vector.load %arg8[%c0_5, %c0_6] : memref<32x1xf32, #tpu.memory_space<vmem>>, vector<32x1xf32>
    tpu.vector_store %arg8[%c0_5, %c0_6], %8 {strides = array<i32>} : memref<32x1xf32, #tpu.memory_space<vmem>>, vector<32x1xf32>,
    %c0_7 = arith.constant 0 : index
    %c0_8 = arith.constant 0 : index
    %10 = vector.load %arg9[%c0_7, %c0_8] : memref<32x1xf32, #tpu.memory_space<vmem>>, vector<32x1xf32>
    %11 = arith.mulf %4, %4 : vector<32x256xf32>
    %cst_9 = arith.constant dense<0.000000e+00> : vector<32xf32>
    %12 = vector.multi_reduction <add>, %11, %cst_9 [1] : vector<32x256xf32> to vector<32xf32>
    %13 = vector.shape_cast %12 : vector<32xf32> to vector<32x1xf32>
    %14 = arith.addf %10, %13 : vector<32x1xf32>
    %c0_10 = arith.constant 0 : index
    %c0_11 = arith.constant 0 : index
    %15 = vector.load %arg9[%c0_10, %c0_11] : memref<32x1xf32, #tpu.memory_space<vmem>>, vector<32x1xf32>
    tpu.vector_store %arg9[%c0_10, %c0_11], %14 {strides = array<i32>} : memref<32x1xf32, #tpu.memory_space<vmem>>, vector<32x1xf32>,
    %c0_i32_12 = arith.constant 0 : i32
    %16 = arith.cmpi eq, %arg1, %c0_i32_12 : i32
    %17 = arith.extui %16 : i1 to i32
    %c0_i32_13 = arith.constant 0 : i32
    %18 = arith.cmpi ne, %17, %c0_i32_13 : i32
    scf.if %18 {
      %c0_14 = arith.constant 0 : index
      %c0_15 = arith.constant 0 : index
      %19 = vector.load %arg8[%c0_14, %c0_15] : memref<32x1xf32, #tpu.memory_space<vmem>>, vector<32x1xf32>
      %cst_16 = arith.constant 2.560000e+02 : f32
      %20 = vector.broadcast %cst_16 : f32 to vector<32x1xf32>
      %21 = arith.divf %19, %20 : vector<32x1xf32>
      %c0_17 = arith.constant 0 : index
      %c0_18 = arith.constant 0 : index
      %22 = vector.load %arg9[%c0_17, %c0_18] : memref<32x1xf32, #tpu.memory_space<vmem>>, vector<32x1xf32>
      %cst_19 = arith.constant 2.560000e+02 : f32
      %23 = vector.broadcast %cst_19 : f32 to vector<32x1xf32>
      %24 = arith.mulf %23, %21 : vector<32x1xf32>
      %25 = arith.mulf %24, %21 : vector<32x1xf32>
      %26 = arith.subf %22, %25 : vector<32x1xf32>
      %cst_20 = arith.constant 2.550000e+02 : f32
      %27 = vector.broadcast %cst_20 : f32 to vector<32x1xf32>
      %28 = arith.divf %26, %27 : vector<32x1xf32>
      %cst_21 = arith.constant 0.000000e+00 : f32
      %29 = vector.broadcast %cst_21 : f32 to vector<32x1xf32>
      %30 = arith.maximumf %28, %29 : vector<32x1xf32>
      %31 = math.sqrt %30 : vector<32x1xf32>
      %c0_22 = arith.constant 0 : index
      %c0_23 = arith.constant 0 : index
      %32 = vector.load %arg3[%c0_22, %c0_23] : memref<32x2xf32, #tpu.memory_space<vmem>>, vector<32x2xf32>
      %33 = vector.extract_strided_slice %32 {offsets = [0, 0], sizes = [32, 1], strides = [1, 1]} : vector<32x2xf32> to vector<32x1xf32>
      %34 = arith.mulf %33, %21 : vector<32x1xf32>
      %35 = vector.extract_strided_slice %32 {offsets = [0, 1], sizes = [32, 1], strides = [1, 1]} : vector<32x2xf32> to vector<32x1xf32>
      %36 = arith.mulf %35, %31 : vector<32x1xf32>
      %37 = arith.addf %34, %36 : vector<32x1xf32>
      %c0_24 = arith.constant 0 : index
      %c0_25 = arith.constant 0 : index
      %38 = vector.load %arg4[%c0_24, %c0_25] : memref<32x1xf32, #tpu.memory_space<vmem>>, vector<32x1xf32>
      %39 = arith.addf %37, %38 : vector<32x1xf32>
      %c0_26 = arith.constant 0 : index
      %c0_27 = arith.constant 0 : index
      %40 = vector.load %arg5[%c0_26, %c0_27] : memref<32x32xf32, #tpu.memory_space<vmem>>, vector<32x32xf32>
      %cst_28 = arith.constant dense<0.000000e+00> : vector<32x1xf32>
      %41 = tpu.matmul %40, %39, %cst_28 {dimension_numbers = #tpu.dot_dimension_numbers<[1], [0], [0], [1], [0, 0, 1, 1], [], []>} : vector<32x32xf32>, vector<32x1xf32>, vector<32x1xf32> -> vector<32x1xf32>
      %c0_29 = arith.constant 0 : index
      %c0_30 = arith.constant 0 : index
      %42 = vector.load %arg6[%c0_29, %c0_30] : memref<32x1xf32, #tpu.memory_space<vmem>>, vector<32x1xf32>
      %43 = arith.addf %41, %42 : vector<32x1xf32>
      %44 = arith.negf %43 : vector<32x1xf32>
      %45 = math.exp %44 : vector<32x1xf32>
      %cst_31 = arith.constant 1.000000e+00 : f32
      %46 = vector.broadcast %cst_31 : f32 to vector<32x1xf32>
      %47 = arith.addf %46, %45 : vector<32x1xf32>
      %48 = arith.divf %46, %47 : vector<32x1xf32>
      %c0_32 = arith.constant 0 : index
      %c0_33 = arith.constant 0 : index
      %c0_34 = arith.constant 0 : index
      %49 = vector.load %arg7[%c0_32, %c0_33, %c0_34] : memref<1x32x1xf32, #tpu.memory_space<vmem>>, vector<1x32x1xf32>
      %50 = vector.shape_cast %49 : vector<1x32x1xf32> to vector<32x1xf32>
      %51 = vector.shape_cast %48 : vector<32x1xf32> to vector<1x32x1xf32>
      tpu.vector_store %arg7[%c0_32, %c0_33, %c0_34], %51 {strides = array<i32>} : memref<1x32x1xf32, #tpu.memory_space<vmem>>, vector<1x32x1xf32>,
    } else {
    }
    return
  }
  func.func @transform_0(%arg0: i32, %arg1: i32) -> (i32, i32, i32) {
    %c0_i32 = arith.constant 0 : i32
    %c0_i32_0 = arith.constant 0 : i32
    return %arg0, %c0_i32, %arg1 : i32, i32, i32
  }
  func.func @transform_1(%arg0: i32, %arg1: i32) -> (i32, i32) {
    %c0_i32 = arith.constant 0 : i32
    %c0_i32_0 = arith.constant 0 : i32
    %c0_i32_1 = arith.constant 0 : i32
    return %c0_i32, %c0_i32_0 : i32, i32
  }
  func.func @transform_2(%arg0: i32, %arg1: i32) -> (i32, i32) {
    %c0_i32 = arith.constant 0 : i32
    %c0_i32_0 = arith.constant 0 : i32
    %c0_i32_1 = arith.constant 0 : i32
    return %c0_i32, %c0_i32_0 : i32, i32
  }
  func.func @transform_3(%arg0: i32, %arg1: i32) -> (i32, i32) {
    %c0_i32 = arith.constant 0 : i32
    %c0_i32_0 = arith.constant 0 : i32
    %c0_i32_1 = arith.constant 0 : i32
    return %c0_i32, %c0_i32_0 : i32, i32
  }
  func.func @transform_4(%arg0: i32, %arg1: i32) -> (i32, i32) {
    %c0_i32 = arith.constant 0 : i32
    %c0_i32_0 = arith.constant 0 : i32
    %c0_i32_1 = arith.constant 0 : i32
    return %c0_i32, %c0_i32_0 : i32, i32
  }
  func.func @transform_5(%arg0: i32, %arg1: i32) -> (i32, i32, i32) {
    %c0_i32 = arith.constant 0 : i32
    %c0_i32_0 = arith.constant 0 : i32
    %c0_i32_1 = arith.constant 0 : i32
    return %arg0, %c0_i32, %c0_i32_0 : i32, i32, i32
  }
}

</mosaic_0001>

<bundles_post_ra>
// kernel: tpu_custom_call.1
= control target key start
LH: loop header
LB: loop body
LE: loop exit
PB: predicated region body
PF: predicated region fallthrough
CT: control target
= control target key end

     0   :  { %10 = vsyncpa [#allocation5], 0  ;;  %s1148_s0 = inlined_call_operand.hbm [shape: f32[2,32,256], index: 0, kind: input, shape index: {}]   ;;  %s1149_s1 = inlined_call_operand.vmem [shape: f32[32,2], index: 1, kind: input, shape index: {}]   ;;  %s1150_s2 = inlined_call_operand.vmem [shape: f32[32,1], index: 2, kind: input, shape index: {}]   ;;  %s1151_s3 = inlined_call_operand.vmem [shape: f32[32,32], index: 3, kind: input, shape index: {}]   ;;  %s1152_s4 = inlined_call_operand.vmem [shape: f32[32,1], index: 4, kind: input, shape index: {}]   ;;  %s1153_s5 = inlined_call_operand.vmem [shape: f32[2,32,1], index: 5, kind: output, shape index: {}]  }
   0x1   :  { %12 = vsyncpa [#allocation5 + $0x1], 0  ;;  %s932_s18 = smov 0   ;;  %s934_s19 = smov 0  }
   0x2   :  { %s936_s20 = smov 0   ;;  %s938_s21 = smov 0  }
   0x3   :  { %s940_s22 = smov 0   ;;  %s942_s23 = smov 0  }
   0x4 LB: > { %s673_s24 = sadd.s32 4294967295, %s894_s23   ;;  %s30_s25 = sadd.s32 1, %s890_s22  ;;  %s894_s23 = sphi %s942_s23, %s18_s23   ;;  %s890_s22 = sphi %s940_s22, %s1161_s22   ;;  %s886_s21 = sphi %s938_s21, %s1160_s21   ;;  %s882_s20 = sphi %s936_s20, %s1159_s20   ;;  %s878_s19 = sphi %s934_s19, %s1158_s19   ;;  %s874_s18 = sphi %s932_s18, %s1157_s18  }
   0x5   : > { %p32_p0 = scmp.ge.s32.totalorder %s30_s25, 2  ;;  %s39_s26 = sadd.s32 1, %s882_s20 }
   0x6   : > { %p46_p1 = scmp.ne.s32.totalorder %s882_s20, %s878_s19  ;;  %p47_p2 = scmp.eq.s32.totalorder %s894_s23, 0 }
   0x7   : > { %s1163_s25 = smov (%p32_p0, %s30_s25), 0  ;;  %p52_p4 = scmp.ne.s32.totalorder %s878_s19, %s874_s18 }
   0x8   : > { %p968_p3 = por %p47_p2, %p46_p1  ;;  %s34_s28 = ssub.s32 %s890_s22, %s1163_s25 }
   0x9   : > { %p53_p5 = scmp.eq.s32.totalorder %s673_s24, 0  ;;  %p37_p6 = scmp.eq.s32.totalorder %s34_s28, 0 }
   0xa   : > { %p736_p8 = scmp.lt.s32.totalorder %s894_s23, 2  ;;  %s198_s6 = sand.u32 1, %s882_s20  }
   0xb   : > { %p975_p7 = por %p53_p5, %p52_p4  ;;  %s694_s7 = sshll.u32 %s890_s22, 10 }
   0xc   : > { %s981_s30 = scalar_select %p37_p6, %s882_s20, %s39_s26  }
   0xd   : > { %s677_s8 = sshll.u32 %s198_s6, 6  ;;  %s988_s11 = scalar_lea.hbm %s1148_s0, %s694_s7 }
   0xe   : > { %s202_s12 = scalar_lea.vmem [#allocation4], %s677_s8  ;;  %p992_p9 = pnand %p736_p8, %p968_p3 }
   0xf   : > { %s211_s13 = sshll.u32 %s202_s12, 4  ;;  %s998_s15 = scalar_lea.sflag [#allocation5], %s198_s6  ;;  %s996_s13 = int_to_ptr.vmem [resolvable:$true] %s211_s13 }
  0x10   : > { %s814_s16 = scalar_lea.hbm %s988_s11, 1024  ;;  %p816_p11 = pneg %p992_p9 }
  0x11   : > { %p815_p10 = scmp.ne.s32.totalorder %s988_s11, %s814_s16  ;;  %s819_s24 = scalar_lea.hbm %s1148_s0, 2048 }
  0x12   : > { %p820_p0 = scmp.lt.u32.totalorder %s988_s11, %s1148_s0  ;;  %p821_p1 = scmp.lt.u32.totalorder %s819_s24, %s814_s16 }
  0x13   : > { %p817_p12 = pnand %p816_p11, %p815_p10  ;;  %p823_p3 = scmp.lt.u32.totalorder %s814_s16, %s988_s11 }
  0x14   : > { %p822_p2 = por %p821_p1, %p820_p0 }
  0x15   : > { %p818_p13 = pneg %p817_p12 }
  0x16   : > { %p824_p4 = por %p823_p3, %p822_p2 }
  0x18   : > { %p825_p5 = pnand %p824_p4, %p818_p13 }
  0x1a   : > { %828 = shalt.err (!%p825_p5)
}
  0x1b   : > { %s829_s28 = scalar_lea.vmem %s996_s13, 1024  ;;  %s896_s6 = smov [#allocation4]  }
  0x1c   : > { %p830_p6 = scmp.ne.s32.totalorder %s996_s13, %s829_s28  ;;  %s834_s7 = sshll.u32 %s896_s6, 4  ;;  %s835_s7 = int_to_ptr.vmem [resolvable:$false] %s834_s7 }
  0x1d   : > { %s836_s8 = scalar_lea.vmem %s835_s7, 2048  ;;  %p837_p12 = scmp.lt.s32.totalorder %s996_s13, %s835_s7 }
  0x1e   : > { %p832_p8 = pnand %p830_p6, %p816_p11  ;;  %p838_p0 = scmp.lt.s32.totalorder %s836_s8, %s829_s28 }
  0x20   : > { %p833_p10 = pneg %p832_p8  ;;  %p839_p1 = por %p838_p0, %p837_p12 }
  0x22   : > { %p840_p2 = pnand %p839_p1, %p833_p10 }
  0x24   : > { %843 = shalt.err (!%p840_p2)
}
  0x25   : > { %s897_s9 = smov 256   ;;  %s898_s10 = smov 16  }
  0x26   : > { %735 = dma.hbm_to_vmem [thread:$0]  (!%p992_p9), %s988_s11, 1024, %s996_s13, %s998_s15, %s897_s9, %s897_s9, %s898_s10  }
  0x27   : > { %p680_p11 = scmp.ge.s32.totalorder %s894_s23, 1  ;;  %p219_p13 = scmp.lt.s32.totalorder %s894_s23, 3 }
  0x29   : > { %p220_p3 = pnand %p680_p11, %p219_p13 }
  0x2a   : > { %s225_s12 = sand.u32 (!%p220_p3), 1, %s878_s19  }
  0x2b   : > { %223 = sbr.rel (%p220_p3) target bundleno = 732 (0x2dc), region = 40  ;;  %s681_s16 = sshll.u32 (!%p220_p3), %s225_s12, 6 }
  0x2c   : > { %s226_s17 = scalar_lea.sflag (!%p220_p3), [#allocation5], %s225_s12  ;;  %s229_s18 = scalar_lea.vmem (!%p220_p3), [#allocation4], %s681_s16 }
  0x32   : > { %869 = dma.done.wait (%p975_p7), %s226_s17, 1024  }
  0x33   : > { %871 = vsyncadd (%p975_p7), %s226_s17, 4294966272  ;;  %vm266_vm0 = vcmask 7168   ;;  %v899_v0 = vmov 0.0   ;;  %v279_v1 = vld [vmem:[%s229_s18 + $0x20] sm:$0xff]  ;;  %v280_v2 = vld [vmem:[%s229_s18 + $0x28] sm:$0xff]  ;;  %s900_s29 = smov 1  }
  0x34   : > { %269 = vst.msk [vmem:[#allocation2 + $0x10] sm:$0xff] %vm266_vm0, %v899_v0  ;;  %267 = vst.msk [vmem:[#allocation2] sm:$0xff] %vm266_vm0, %v899_v0  ;;  %v275_v3 = vld [vmem:[%s229_s18] sm:$0xff]  ;;  %v293_v4 = vadd.f32 %v280_v2, %v279_v1  ;;  %v276_v5 = vld [vmem:[%s229_s18 + $0x8] sm:$0xff]  ;;  %v316_v20 = vmul.f32 %v279_v1, %v279_v1  ;;  %v317_v21 = vmul.f32 %v280_v2, %v280_v2  ;;  %s901_s24 = smov 127   ;;  %vm469_vm9 = vcmask 261120  }
  0x35   : > { %268 = vst.msk [vmem:[#allocation2 + $0x8] sm:$0xff] %vm266_vm0, %v899_v0  ;;  %270 = vst.msk [vmem:[#allocation2 + $0x18] sm:$0xff] %vm266_vm0, %v899_v0  ;;  %v281_v6 = vld [vmem:[%s229_s18 + $0x30] sm:$0xff]  ;;  %v282_v7 = vld [vmem:[%s229_s18 + $0x38] sm:$0xff]  ;;  %v287_v8 = vadd.f32 %v276_v5, %v275_v3  ;;  %v312_v14 = vmul.f32 %v275_v3, %v275_v3  ;;  %v313_v15 = vmul.f32 %v276_v5, %v276_v5  ;;  %p257_p7 = scmp.lt.s32.totalorder %s886_s21, 1 }
  0x36   : > { %271 = vst.msk [vmem:[#allocation3] sm:$0xff] %vm266_vm0, %v899_v0  ;;  %272 = vst.msk [vmem:[#allocation3 + $0x8] sm:$0xff] %vm266_vm0, %v899_v0  ;;  %v277_v9 = vld [vmem:[%s229_s18 + $0x10] sm:$0xff]  ;;  %v278_v10 = vld [vmem:[%s229_s18 + $0x18] sm:$0xff]  ;;  %294 = vadd.xlane.f32.xlu1 %v293_v4  ;;  %v296_v11 = vadd.f32 %v282_v7, %v281_v6  ;;  %v318_v18 = vmul.f32 %v281_v6, %v281_v6  ;;  %v319_v19 = vmul.f32 %v282_v7, %v282_v7 }
  0x37   : > { %273 = vst.msk [vmem:[#allocation3 + $0x10] sm:$0xff] %vm266_vm0, %v899_v0  ;;  %274 = vst.msk [vmem:[#allocation3 + $0x18] sm:$0xff] %vm266_vm0, %v899_v0  ;;  %v314_v12 = vmul.f32 %v277_v9, %v277_v9  ;;  %v315_v13 = vmul.f32 %v278_v10, %v278_v10  ;;  %288 = vadd.xlane.f32.xlu0 %v287_v8  ;;  %v290_v16 = vadd.f32 %v278_v10, %v277_v9  ;;  %s1165_s21 = smov (!%p257_p7, %s886_s21), 1 }
  0x38   : > { %v320_v22 = vadd.f32 %v313_v15, %v312_v14  ;;  %v329_v23 = vadd.f32 %v319_v19, %v318_v18  ;;  %v326_v24 = vadd.f32 %v317_v21, %v316_v20  ;;  %s695_s17 = sshll.u32 %s1165_s21, 5 }
  0x39   : > { %v323_v17 = vadd.f32 %v315_v13, %v314_v12  ;;  %s261_s11 = scalar_lea.vmem %s1153_s5, %s695_s17 }
  0x3a   : > { %297 = vadd.xlane.f32.xlu1 %v296_v11 }
  0x3b   : > { %291 = vadd.xlane.f32.xlu0 %v290_v16  ;;  %v285_v25 = vld [vmem:[#allocation2 + $0x10] sm:$0xff]  ;;  %v283_v26 = vld [vmem:[#allocation2] sm:$0xff] }
  0x3c   : > { %v286_v31 = vld [vmem:[#allocation2 + $0x18] sm:$0xff]  ;;  %v284_v32 = vld [vmem:[#allocation2 + $0x8] sm:$0xff] }
  0x3d   : > { %v309_v37 = vld [vmem:[#allocation3 + $0x8] sm:$0xff]  ;;  %v308_v38 = vld [vmem:[#allocation3] sm:$0xff] }
  0x3e   : > { %324 = vadd.xlane.f32.xlu1 %v323_v17  ;;  %v311_v43 = vld [vmem:[#allocation3 + $0x18] sm:$0xff]  ;;  %v310_v44 = vld [vmem:[#allocation3 + $0x10] sm:$0xff] }
  0x3f   : > { %321 = vadd.xlane.f32.xlu0 %v320_v22 }
  0x42   : > { %330 = vadd.xlane.f32.xlu1 %v329_v23 }
  0x43   : > { %327 = vadd.xlane.f32.xlu0 %v326_v24 }
  0xc3   : > { %v295_v27 = vpop.xlane.xlu1 %294 }
  0xc4   : > { %v301_v28 = vadd.f32 %v295_v27, %v285_v25  ;;  %v289_v29 = vpop.xlane.xlu0 %288 }
  0xc5   : > { %v299_v30 = vadd.f32 %v289_v29, %v283_v26 }
  0xc6   : > { %306 = vst.msk [vmem:[#allocation2 + $0x10] sm:$0xff] %vm266_vm0, %v301_v28 }
  0xc7   : > { %304 = vst.msk [vmem:[#allocation2] sm:$0xff] %vm266_vm0, %v299_v30  ;;  %v298_v33 = vpop.xlane.xlu1 %297 }
  0xc8   : > { %v302_v34 = vadd.f32 %v298_v33, %v286_v31  ;;  %v292_v35 = vpop.xlane.xlu0 %291 }
  0xc9   : > { %v300_v36 = vadd.f32 %v292_v35, %v284_v32 }
  0xca   : > { %307 = vst.msk [vmem:[#allocation2 + $0x18] sm:$0xff] %vm266_vm0, %v302_v34 }
  0xcb   : > { %305 = vst.msk [vmem:[#allocation2 + $0x8] sm:$0xff] %vm266_vm0, %v300_v36  ;;  %v325_v39 = vpop.xlane.xlu1 %324 }
  0xcc   : > { %v333_v40 = vadd.f32 %v325_v39, %v309_v37  ;;  %v322_v41 = vpop.xlane.xlu0 %321  ;;  %v405_v37 = vld [vmem:[%s1149_s1] sm:$0xff] }
  0xcd   : > { %v332_v42 = vadd.f32 %v322_v41, %v308_v38  ;;  %v345_v46 = vld [vmem:[#allocation2 + $0x10] sm:$0xff] }
  0xce   : > { %337 = vst.msk [vmem:[#allocation3 + $0x8] sm:$0xff] %vm266_vm0, %v333_v40  ;;  %v343_v45 = vld [vmem:[#allocation2] sm:$0xff]  ;;  %v1050_v53 = vmul.f32 0.00390625, %v345_v46  ;;  %v406_v40 = vld [vmem:[%s1149_s1 + $0x8] sm:$0xff] }
  0xcf   : > { %336 = vst.msk [vmem:[#allocation3] sm:$0xff] %vm266_vm0, %v332_v42  ;;  %v331_v47 = vpop.xlane.xlu1 %330  ;;  %v1047_v48 = vmul.f32 0.00390625, %v343_v45  ;;  %v461_v46 = vld [vmem:[%s1151_s3] sm:$0xff] }
  0xd0   : > { %v335_v49 = vadd.f32 %v331_v47, %v311_v43  ;;  %v328_v50 = vpop.xlane.xlu0 %327  ;;  %v358_v61 = vmul.f32 256.0, %v1050_v53  ;;  %v407_v43 = vld [vmem:[%s1149_s1 + $0x10] sm:$0xff]  ;;  %712 = vmatprep.mubr.msk.f32.mxu0 %vm469_vm9, %v461_v46 }
  0xd1   : > { %v334_v51 = vadd.f32 %v328_v50, %v310_v44  ;;  %v356_v52 = vmul.f32 256.0, %v1047_v48  ;;  %v346_v54 = vld [vmem:[#allocation2 + $0x18] sm:$0xff]  ;;  %v463_v47 = vld [vmem:[%s1151_s3 + $0x10] sm:$0xff] }
  0xd2   : > { %339 = vst.msk [vmem:[#allocation3 + $0x18] sm:$0xff] %vm266_vm0, %v335_v49  ;;  %v344_v55 = vld [vmem:[#allocation2 + $0x8] sm:$0xff]  ;;  %v1053_v56 = vmul.f32 0.00390625, %v346_v54  ;;  %v362_v5 = vmul.f32 %v358_v61, %v1050_v53  ;;  %715 = vmatprep.mubr.msk.f32.mxu1 %vm469_vm9, %v463_v47  ;;  %v408_v49 = vld [vmem:[%s1149_s1 + $0x18] sm:$0xff] }
  0xd3   : > { %338 = vst.msk [vmem:[#allocation3 + $0x10] sm:$0xff] %vm266_vm0, %v334_v51  ;;  %v1056_v57 = vmul.f32 0.00390625, %v344_v55  ;;  %v360_v59 = vmul.f32 %v356_v52, %v1047_v48  ;;  %v409_v52 = vmul.f32 %v405_v37, %v1047_v48  ;;  %v411_v48 = vmul.f32 %v407_v43, %v1050_v53 }
  0xd4   : > { %v359_v58 = vmul.f32 256.0, %v1053_v56 }
  0xd5   : > { %v357_v60 = vmul.f32 256.0, %v1056_v57  ;;  %v353_v63 = vld [vmem:[#allocation3 + $0x8] sm:$0xff] }
  0xd6   : > { %v352_v62 = vld [vmem:[#allocation3] sm:$0xff]  ;;  %v363_v2 = vmul.f32 %v359_v58, %v1053_v56  ;;  %v410_v58 = vmul.f32 %v406_v40, %v1056_v57 }
  0xd7   : > { %v364_v0 = vsub.f32 %v352_v62, %v360_v59  ;;  %v361_v1 = vmul.f32 %v357_v60, %v1056_v57  ;;  %v453_v59 = vld [vmem:[%s1150_s2] sm:$0xff]  ;;  %v454_v60 = vld [vmem:[%s1150_s2 + $0x8] sm:$0xff]  ;;  %v412_v57 = vmul.f32 %v408_v49, %v1053_v56 }
  0xd8   : > { %v462_v56 = vld [vmem:[%s1151_s3 + $0x8] sm:$0xff] }
  0xd9   : > { %v369_v3 = vmul.f32 0.003921569, %v364_v0  ;;  %v365_v4 = vsub.f32 %v353_v63, %v361_v1  ;;  %v355_v6 = vld [vmem:[#allocation3 + $0x18] sm:$0xff] }
  0xda   : > { %v354_v7 = vld [vmem:[#allocation3 + $0x10] sm:$0xff]  ;;  %v367_v8 = vsub.f32 %v355_v6, %v363_v2 }
  0xdb   : > { %v373_v9 = vmax.f32 %v369_v3, 0.0  ;;  %v370_v10 = vmul.f32 0.003921569, %v365_v4  ;;  %v366_v11 = vsub.f32 %v354_v7, %v362_v5  ;;  %v455_v4 = vld [vmem:[%s1150_s2 + $0x10] sm:$0xff]  ;;  %v456_v5 = vld [vmem:[%s1150_s2 + $0x18] sm:$0xff] }
  0xdc   : > { %v372_v12 = vmul.f32 0.003921569, %v367_v8 }
  0xdd   : > { %790 = vrsqrt.f32 %v373_v9  ;;  %v374_v13 = vmax.f32 %v370_v10, 0.0  ;;  %v371_v14 = vmul.f32 0.003921569, %v366_v11  ;;  %vm379_vm1 = vcmp.eq.f32.partialorder %v373_v9, inf  ;;  %v464_v10 = vld [vmem:[%s1151_s3 + $0x18] sm:$0xff]  ;;  %v466_v11 = vld [vmem:[%s1152_s4 + $0x8] sm:$0xff] }
  0xde   : > { %v376_v15 = vmax.f32 %v372_v12, 0.0  ;;  %v382_v19 = vand.u32 2147483648, %v373_v9  ;;  %vm381_vm2 = vcmp.eq.f32.partialorder %v373_v9, 0.0  ;;  %v468_v12 = vld [vmem:[%s1152_s4 + $0x18] sm:$0xff] }
  0xdf   : > { %792 = vrsqrt.f32 %v374_v13  ;;  %v375_v16 = vmax.f32 %v371_v14, 0.0  ;;  %vm386_vm3 = vcmp.eq.f32.partialorder %v374_v13, inf  ;;  %v389_v25 = vand.u32 2147483648, %v374_v13  ;;  %v467_v14 = vld [vmem:[%s1152_s4 + $0x10] sm:$0xff] }
  0xe0   : > { %794 = vrsqrt.f32 %v376_v15  ;;  %vm388_vm4 = vcmp.eq.f32.partialorder %v374_v13, 0.0  ;;  %vm400_vm7 = vcmp.eq.f32.partialorder %v376_v15, inf  ;;  %v403_v35 = vand.u32 2147483648, %v376_v15 }
  0xe1   : > { %796 = vrsqrt.f32 %v375_v16  ;;  %vm393_vm5 = vcmp.eq.f32.partialorder %v375_v16, inf  ;;  %v396_v32 = vand.u32 2147483648, %v375_v16  ;;  %vm395_vm6 = vcmp.eq.f32.partialorder %v375_v16, 0.0 }
  0xe2   : > { %vm402_vm8 = vcmp.eq.f32.partialorder %v376_v15, 0.0 }
  0xe7   : > { %v791_v17 = vpop.eup %790 }
  0xe8   : > { %v378_v18 = vmul.f32 %v791_v17, %v373_v9 }
  0xe9   : > { %v793_v20 = vpop.eup %792 }
  0xea   : > { %v380_v21 = vsel %vm379_vm1, %v373_v9, %v378_v18  ;;  %v385_v23 = vmul.f32 %v793_v20, %v374_v13  ;;  %v795_v24 = vpop.eup %794 }
  0xeb   : > { %v383_v22 = vsel %vm381_vm2, %v382_v19, %v380_v21  ;;  %v797_v26 = vpop.eup %796  ;;  %v399_v30 = vmul.f32 %v795_v24, %v376_v15 }
  0xec   : > { %417 = vrot.lane.b32.xlu0 %v383_v22, %s900_s29  ;;  %v387_v27 = vsel %vm386_vm3, %v374_v13, %v385_v23  ;;  %v392_v29 = vmul.f32 %v797_v26, %v375_v16  ;;  %v465_v13 = vld [vmem:[%s1152_s4] sm:$0xff] }
  0xed   : > { %v390_v28 = vsel %vm388_vm4, %v389_v25, %v387_v27  ;;  %v401_v34 = vsel %vm400_vm7, %v376_v15, %v399_v30 }
  0xee   : > { %419 = vrot.lane.b32.xlu1 %v390_v28, %s900_s29  ;;  %v394_v31 = vsel %vm393_vm5, %v375_v16, %v392_v29  ;;  %v404_v36 = vsel %vm402_vm8, %v403_v35, %v401_v34 }
  0xef   : > { %v397_v33 = vsel %vm395_vm6, %v396_v32, %v394_v31 }
  0xf2   : > { %421 = vrot.lane.b32.xlu1 %v397_v33, %s900_s29 }
  0xf6   : > { %423 = vrot.lane.b32.xlu1 %v404_v36, %s900_s29 }
 0x15e   : > { %v418_v38 = vpop.permute.xlu0 %417 }
 0x15f   : > { %v429_v39 = vmul.f32 %v418_v38, %v405_v37 }
 0x160   : > { %v420_v41 = vpop.permute.xlu1 %419 }
 0x161   : > { %437 = vrot.lane.b32.xlu0 %v429_v39, %s901_s24  ;;  %v430_v42 = vmul.f32 %v420_v41, %v406_v40 }
 0x163   : > { %439 = vrot.lane.b32.xlu1 %v430_v42, %s901_s24 }
 0x164   : > { %v422_v44 = vpop.permute.xlu1 %421 }
 0x165   : > { %v431_v45 = vmul.f32 %v422_v44, %v407_v43 }
 0x167   : > { %441 = vrot.lane.b32.xlu0 %v431_v45, %s901_s24 }
 0x168   : > { %v424_v50 = vpop.permute.xlu1 %423 }
 0x169   : > { %v432_v51 = vmul.f32 %v424_v50, %v408_v49 }
 0x16b   : > { %443 = vrot.lane.b32.xlu1 %v432_v51, %s901_s24 }
 0x1d3   : > { %v438_v54 = vpop.permute.xlu0 %437 }
 0x1d4   : > { %v449_v55 = vadd.f32 %v438_v54, %v409_v52 }
 0x1d5   : > { %v440_v61 = vpop.permute.xlu1 %439 }
 0x1d6   : > { %v450_v62 = vadd.f32 %v440_v61, %v410_v58  ;;  %v457_v63 = vadd.f32 %v453_v59, %v449_v55 }
 0x1d8   : > { %v458_v0 = vadd.f32 %v454_v60, %v450_v62 }
 0x1d9   : > { %v442_v1 = vpop.permute.xlu0 %441 }
 0x1da   : > { %v718_v2 = vpack.c.bf16 %v458_v0, %v457_v63  ;;  %v451_v3 = vadd.f32 %v442_v1, %v411_v48 }
 0x1dc   : > { %719 = vmatprep.subr.bf16.mxu0 %v718_v2  ;;  %726 = vmatprep.subr.bf16.mxu1 %v718_v2  ;;  %v459_v8 = vadd.f32 %v455_v4, %v451_v3 }
 0x1dd   : > { %v444_v6 = vpop.permute.xlu1 %443  ;;  %721 = vmatpush3.bf16.msra.mxu0 %v718_v2  ;;  %728 = vmatpush3.bf16.msra.mxu1 %v718_v2 }
 0x1de   : > { %v452_v7 = vadd.f32 %v444_v6, %v412_v57 }
 0x1e0   : > { %v460_v9 = vadd.f32 %v456_v5, %v452_v7 }
 0x1e2   : > { %v722_v53 = vpack.c.bf16 %v460_v9, %v459_v8 }
 0x1e4   : > { %723 = vmatprep.subr.bf16.mxu0 %v722_v53  ;;  %727 = vmatprep.subr.bf16.mxu1 %v722_v53 }
 0x1e5   : > { %725 = vmatpush3.bf16.msra.mxu0 %v722_v53  ;;  %729 = vmatpush3.bf16.msra.mxu1 %v722_v53 }
 0x1e8   : > { %713 = vmatmul.mubr.msk.f32.vlgmr.msra.gmra.mrb[0].mxu0 %vm469_vm9, %v462_v56  ;;  %716 = vmatmul.mubr.msk.f32.vlgmr.msra.gmra.mrb[0].mxu1 %vm469_vm9, %v464_v10 }
 0x2bb   : > { %v714_v15 = vpop.f32.mrb[0].mxu0  ;;  %v717_v16 = vpop.f32.mrb[0].mxu1 }
 0x2bc   : > { %v554_v17 = vadd.f32 %v714_v15, %v466_v11  ;;  %v564_v18 = vadd.f32 %v717_v16, %v468_v12  ;;  %v548_v19 = vpop.f32.mrb[1].mxu0  ;;  %v558_v20 = vpop.f32.mrb[1].mxu1 }
 0x2bd   : > { %v549_v21 = vadd.f32 %v548_v19, %v465_v13  ;;  %v559_v22 = vadd.f32 %v558_v20, %v467_v14 }
 0x2be   : > { %v689_v23 = vmul.f32 -1.442695, %v554_v17  ;;  %v691_v24 = vmul.f32 -1.442695, %v564_v18 }
 0x2bf   : > { %v688_v25 = vmul.f32 -1.442695, %v549_v21  ;;  %v690_v26 = vmul.f32 -1.442695, %v559_v22 }
 0x2c0   : > { %798 = vpow2.f32 %v689_v23 }
 0x2c1   : > { %800 = vpow2.f32 %v691_v24 }
 0x2c2   : > { %802 = vpow2.f32 %v688_v25 }
 0x2c3   : > { %804 = vpow2.f32 %v690_v26 }
 0x2ca   : > { %v799_v27 = vpop.eup %798 }
 0x2cb   : > { %v801_v28 = vpop.eup %800  ;;  %v580_v29 = vadd.f32 1.0, %v799_v27 }
 0x2cc   : > { %v803_v30 = vpop.eup %802  ;;  %v582_v31 = vadd.f32 1.0, %v801_v28 }
 0x2cd   : > { %v805_v32 = vpop.eup %804  ;;  %806 = vrcp.f32 %v580_v29  ;;  %v579_v33 = vadd.f32 1.0, %v803_v30 }
 0x2ce   : > { %808 = vrcp.f32 %v582_v31  ;;  %v581_v34 = vadd.f32 1.0, %v805_v32 }
 0x2cf   : > { %810 = vrcp.f32 %v579_v33 }
 0x2d0   : > { %812 = vrcp.f32 %v581_v34 }
 0x2d7   : > { %v807_v35 = vpop.eup %806 }
 0x2d8   : > { %v809_v36 = vpop.eup %808  ;;  %592 = vst.msk [vmem:[%s261_s11 + $0x8] sm:$0xff] %vm266_vm0, %v807_v35 }
 0x2d9   : > { %v811_v37 = vpop.eup %810  ;;  %594 = vst.msk [vmem:[%s261_s11 + $0x18] sm:$0xff] %vm266_vm0, %v809_v36 }
 0x2da   : > { %v813_v38 = vpop.eup %812  ;;  %591 = vst.msk [vmem:[%s261_s11] sm:$0xff] %vm266_vm0, %v811_v37 }
 0x2db   : > { %593 = vst.msk [vmem:[%s261_s11 + $0x10] sm:$0xff] %vm266_vm0, %v813_v38 }
 0x2dc PF: > { %s18_s23 = sadd.s32 1, %s894_s23   ;;  %s1157_s18 = smov %s878_s19 }
 0x2dd   : > { %p15_p9 = scmp.ge.s32.totalorder %s18_s23, 4   ;;  %s1158_s19 = smov %s882_s20 }
 0x2de   : > { %s1159_s20 = smov %s981_s30  ;;  %s1160_s21 = smov %s890_s22 }
 0x2df   : > { %s1161_s22 = smov %s1163_s25  ;;  %17 = sbr.rel (!%p15_p9) target bundleno = 4 (0x4), region = 88 }
 0x2e6   :  { %616 = vsyncpa [#allocation5], 1 }
 0x2e7   :  { %618 = vsyncpa [#allocation5 + $0x1], 1 }

</bundles_post_ra>
